<compile_context>
chip_gen: v6e
topology: v6e:2x2x1
jax: 0.10.0
libtpu: 0.0.40
codegen_flags: <defaults>
</compile_context>

<pallas_src>
import functools

import jax
import jax.numpy as jnp
from jax.experimental import pallas as pl
from jax.experimental.pallas import tpu as pltpu

LANE = 128


def _round_up(x, m):
    return ((x + m - 1) // m) * m


def _tile_sizes(n_nodes, tm, tk):
    """Clamp tile sizes to the 128-padded node count; derive padded extents."""
    np128 = _round_up(n_nodes, LANE)
    tm = min(tm, np128)
    tk = min(tk, np128)
    assert tm % LANE == 0 and tk % LANE == 0, "tile sizes must be multiples of 128"
    return tm, tk, _round_up(n_nodes, tm), _round_up(n_nodes, tk)


def prepare_adjacency(adj, *, tm=512, tk=512):
    """Pad + cast the dense 0/1 adjacency to int8 ONCE, outside the hot path.

    int8 halves the dominant HBM stream vs bf16 (4x vs fp32); doing the
    pad/cast here avoids re-materializing the N x N matrix per forward call.
    """
    n = adj.shape[0]
    assert adj.shape == (n, n)
    _, _, n_rows, n_cols = _tile_sizes(n, tm, tk)
    adj_p = jnp.pad(adj, ((0, n_rows - n), (0, n_cols - n)))
    return adj_p.astype(jnp.int8)


def gcn_kernel(x_ref, adj_ref, w_pre_ref, b_pre_ref, w_post_ref, b_post_ref,
               o_ref, acc_ref, *, tk):
    """One (row-tile i, neighbor-tile k) step of
       out = (A @ (x @ W_pre + b_pre)) @ W_post + b_post."""
    k = pl.program_id(1)

    # Start of the neighbor reduction for this row tile: zero the fp32 acc.
    @pl.when(k == 0)
    def _():
        acc_ref[...] = jnp.zeros_like(acc_ref)

    # K-slice of the VMEM-resident source-node features (x has a constant
    # index_map, so it is DMA'd from HBM only once for the whole grid).
    col0 = pl.multiple_of(k * tk, tk)
    x_k = x_ref[pl.ds(col0, tk), :]

    # pre_mod (per-node Linear) on this K-slice of source nodes:
    #   h_k = x_k @ W_pre + b_pre   (bf16 MXU operands, fp32 accumulate + bias)
    # Recomputing per row tile costs ~F_in/tm of the dominant flops and avoids
    # streaming a wider precomputed h from HBM.
    h = jnp.dot(x_k, w_pre_ref[...], preferred_element_type=jnp.float32)
    h = h + b_pre_ref[...]

    # g.push(func=sum): neighbor-sum aggregation, one adjacency tile at a time.
    # The 0/1 adjacency arrives as int8 and is widened to bf16 on the VPU
    # (lossless for 0/1).  A @ (h + b_pre) decomposes exactly over K tiles, so
    # adding b_pre per slice before the matmul is correct (the bias is weighted
    # by node degree, matching the reference semantics).  Padded source rows
    # have zero adjacency columns, so they contribute nothing.
    adj = adj_ref[...].astype(jnp.bfloat16)
    acc_ref[...] += jnp.dot(adj, h.astype(jnp.bfloat16),
                            preferred_element_type=jnp.float32)

    # post_mod (per-node Linear) only once the reduction over k is complete.
    @pl.when(k == pl.num_programs(1) - 1)
    def _():
        out = jnp.dot(acc_ref[...].astype(jnp.bfloat16), w_post_ref[...],
                      preferred_element_type=jnp.float32)
        o_ref[...] = (out + b_post_ref[...]).astype(o_ref.dtype)


def gcn_forward(x, adj, w_pre, b_pre, w_post, b_post, *, tm=512, tk=512):
    """Pallas GCN forward: (adj @ (x @ w_pre + b_pre)) @ w_post + b_post.

    tm/tk are the (destination-row, neighbor) adjacency tile sizes; 512 keeps
    the (mem-bound) adjacency stream near the HBM roofline on v5e/v6e/v7x.
    On v7x choose tm so that ceil(N/tm) >= 2 so the 'parallel' row axis shards
    across both TensorCores.  `adj` may be the raw (N, N) 0/1 matrix or the
    output of prepare_adjacency (preferred in the hot path).
    """
    N, F_in = x.shape
    H = w_pre.shape[1]
    F_out = w_post.shape[1]
    assert w_post.shape[0] == H

    tm, tk, n_rows, n_cols = _tile_sizes(N, tm, tk)
    h_p = _round_up(H, LANE)
    f_out_p = _round_up(F_out, LANE)

    pad2 = lambda a, r, c: jnp.pad(a, ((0, r - a.shape[0]), (0, c - a.shape[1])))

    if adj.shape == (n_rows, n_cols) and adj.dtype == jnp.int8:
        adj_p = adj                                   # already prepared once
    else:
        assert adj.shape == (N, N)
        adj_p = pad2(adj, n_rows, n_cols).astype(jnp.int8)

    x_p = pad2(x, n_cols, F_in).astype(jnp.bfloat16)
    w_pre_p = pad2(w_pre, F_in, h_p).astype(jnp.bfloat16)
    b_pre_p = pad2(b_pre.reshape(1, -1), 1, h_p).astype(jnp.float32)
    w_post_p = pad2(w_post, h_p, f_out_p).astype(jnp.bfloat16)
    b_post_p = pad2(b_post.reshape(1, -1), 1, f_out_p).astype(jnp.float32)

    grid = (n_rows // tm, n_cols // tk)

    # Advisory cost hint for the XLA scheduler around the custom call.
    flops = (2 * n_rows * n_cols * h_p                 # A @ h (dominant)
             + 2 * grid[0] * n_cols * F_in * h_p       # pre-layer (per row tile)
             + 2 * n_rows * h_p * f_out_p)             # post-layer epilogue
    bytes_accessed = (adj_p.size                       # int8 adjacency stream
                      + x_p.size * 2                   # x resident: DMA'd once
                      + n_rows * f_out_p * 4
                      + w_pre_p.size * 2 + w_post_p.size * 2
                      + b_pre_p.size * 4 + b_post_p.size * 4)

    kernel = functools.partial(gcn_kernel, tk=tk)

    out = pl.pallas_call(
        kernel,
        out_shape=jax.ShapeDtypeStruct((n_rows, f_out_p), jnp.float32),
        grid_spec=pltpu.PrefetchScalarGridSpec(
            num_scalar_prefetch=0,
            grid=grid,
            in_specs=[
                # Full padded x, constant block index -> VMEM-resident, sliced
                # per K tile in-kernel (kills the per-row-tile x re-DMA).
                pl.BlockSpec((n_cols, F_in), lambda i, k: (0, 0)),
                # Adjacency tile (int8): destination rows i, source columns k.
                pl.BlockSpec((tm, tk), lambda i, k: (i, k)),
                # Weights / biases: constant block index -> resident in VMEM.
                pl.BlockSpec((F_in, h_p), lambda i, k: (0, 0)),
                pl.BlockSpec((1, h_p), lambda i, k: (0, 0)),
                pl.BlockSpec((h_p, f_out_p), lambda i, k: (0, 0)),
                pl.BlockSpec((1, f_out_p), lambda i, k: (0, 0)),
            ],
            out_specs=pl.BlockSpec((tm, f_out_p), lambda i, k: (i, 0)),
            scratch_shapes=[pltpu.VMEM((tm, h_p), jnp.float32)],
        ),
        compiler_params=pltpu.CompilerParams(
            # Row tiles are independent (megacore-shardable on v7x); the
            # neighbor axis is the carried reduction.
            dimension_semantics=("parallel", "arbitrary"),
        ),
        cost_estimate=pl.CostEstimate(flops=int(flops), transcendentals=0,
                                      bytes_accessed=int(bytes_accessed)),
    )(x_p, adj_p, w_pre_p, b_pre_p, w_post_p, b_post_p)

    return out[:N, :F_out]


if __name__ == "__main__":
    key = jax.random.PRNGKey(0)
    k_x, k_adj, k_wpre, k_bpre, k_wpost, k_bpost = jax.random.split(key, 6)

    # Small GCN-consistent shapes.  N=500 with tm=256 / tk=128 exercises ragged
    # padding, multiple row tiles and a multi-step neighbor reduction
    # (grid = (2, 4)) while staying tiny.  Production defaults are 512x512.
    N, F_in, H, F_out = 500, 32, 32, 16
    TM, TK = 256, 128

    x = jax.random.normal(k_x, (N, F_in), dtype=jnp.float32)

    # Random sparse-ish adjacency (~10% density, no self loops) as dense 0/1.
    adj = (jax.random.uniform(k_adj, (N, N)) < 0.1).astype(jnp.float32)
    adj = adj * (1.0 - jnp.eye(N, dtype=jnp.float32))

    # Deterministic Linear params (torch nn.Linear-style uniform init bounds).
    bnd_pre = 1.0 / (F_in ** 0.5)
    w_pre = jax.random.uniform(k_wpre, (F_in, H), minval=-bnd_pre, maxval=bnd_pre)
    b_pre = jax.random.uniform(k_bpre, (1, H), minval=-bnd_pre, maxval=bnd_pre)
    bnd_post = 1.0 / (H ** 0.5)
    w_post = jax.random.uniform(k_wpost, (H, F_out), minval=-bnd_post, maxval=bnd_post)
    b_post = jax.random.uniform(k_bpost, (1, F_out), minval=-bnd_post, maxval=bnd_post)

    # Hot-path usage: pad + int8-cast the adjacency once, outside the call.
    adj_i8 = prepare_adjacency(adj, tm=TM, tk=TK)

    out = gcn_forward(x, adj_i8, w_pre, b_pre, w_post, b_post, tm=TM, tk=TK)
    out = jax.block_until_ready(out)
    assert out.shape == (N, F_out)

    # Reference 1: same math with the kernel's precision (bf16 MXU operands,
    # fp32 accumulation / biases).  Should agree up to fp32 summation order and
    # the rare one-ulp bf16 double-rounding difference.
    bf = lambda a: a.astype(jnp.bfloat16)
    h_ref = jnp.dot(bf(x), bf(w_pre), preferred_element_type=jnp.float32) + b_pre
    agg_ref = jnp.dot(bf(adj), bf(h_ref), preferred_element_type=jnp.float32)
    ref_mixed = jnp.dot(bf(agg_ref), bf(w_post),
                        preferred_element_type=jnp.float32) + b_post
    assert jnp.allclose(out, ref_mixed, atol=1e-2, rtol=1e-2)

    # Reference 2: pure fp32 module semantics.  bf16 operand rounding (~2^-8)
    # accumulated over ~0.1*N neighbors makes per-element absolute errors up to
    # ~0.1 on near-zero outputs, so compare relative to the output scale.
    ref_f32 = (adj @ (x @ w_pre + b_pre)) @ w_post + b_post
    rel_err = jnp.max(jnp.abs(out - ref_f32)) / jnp.max(jnp.abs(ref_f32))
    assert rel_err < 2e-2, rel_err

    print("KERNEL_OK")
</pallas_src>

<mosaic_0001>
module attributes {stable_mosaic.version = 11 : i64} {
  func.func @gcn_kernel(%arg0: i32, %arg1: i32, %arg2: memref<512x32xbf16, #tpu.memory_space<vmem>>, %arg3: memref<256x128xi8, #tpu.memory_space<vmem>>, %arg4: memref<32x128xbf16, #tpu.memory_space<vmem>>, %arg5: memref<1x128xf32, #tpu.memory_space<vmem>>, %arg6: memref<128x128xbf16, #tpu.memory_space<vmem>>, %arg7: memref<1x128xf32, #tpu.memory_space<vmem>>, %arg8: memref<256x128xf32, #tpu.memory_space<vmem>>, %arg9: memref<256x128xf32, #tpu.memory_space<vmem>>) attributes {dimension_semantics = [#tpu.dimension_semantics<parallel>, #tpu.dimension_semantics<arbitrary>], iteration_bounds = array<i64: 2, 4>, scalar_prefetch = 0 : i64, scratch_operands = 1 : i64, tpu.core_type = #tpu.core_type<tc>, window_params = [{pipeline_mode = #tpu.pipeline_mode<synchronous>, transform_indices = @transform_0, window_bounds = array<i64: 512, 32>}, {transform_indices = @transform_1, window_bounds = array<i64: 256, 128>}, {pipeline_mode = #tpu.pipeline_mode<synchronous>, transform_indices = @transform_2, window_bounds = array<i64: 32, 128>}, {pipeline_mode = #tpu.pipeline_mode<synchronous>, transform_indices = @transform_3, window_bounds = array<i64: 1, 128>}, {pipeline_mode = #tpu.pipeline_mode<synchronous>, transform_indices = @transform_4, window_bounds = array<i64: 128, 128>}, {pipeline_mode = #tpu.pipeline_mode<synchronous>, transform_indices = @transform_5, window_bounds = array<i64: 1, 128>}, {transform_indices = @transform_6, window_bounds = array<i64: 256, 128>}]} {
    %c0_i32 = arith.constant 0 : i32
    %0 = arith.cmpi eq, %arg1, %c0_i32 : i32
    %1 = arith.extui %0 : i1 to i32
    %c0_i32_0 = arith.constant 0 : i32
    %2 = arith.cmpi ne, %1, %c0_i32_0 : i32
    scf.if %2 {
      %cst_13 = arith.constant 0.000000e+00 : f32
      %22 = vector.broadcast %cst_13 : f32 to vector<256x128xf32>
      %c0_14 = arith.constant 0 : index
      %c0_15 = arith.constant 0 : index
      %23 = vector.load %arg9[%c0_14, %c0_15] : memref<256x128xf32, #tpu.memory_space<vmem>>, vector<256x128xf32>
      tpu.vector_store %arg9[%c0_14, %c0_15], %22 {strides = array<i32>} : memref<256x128xf32, #tpu.memory_space<vmem>>, vector<256x128xf32>,
    } else {
    }
    %c128_i32 = arith.constant 128 : i32
    %3 = arith.muli %arg1, %c128_i32 : i32
    %4 = tpu.assume_multiple %3, 128 : i32
    %5 = arith.index_cast %4 : i32 to index
    %c0 = arith.constant 0 : index
    %6 = vector.load %arg2[%5, %c0] : memref<512x32xbf16, #tpu.memory_space<vmem>>, vector<128x32xbf16>
    %c0_1 = arith.constant 0 : index
    %c0_2 = arith.constant 0 : index
    %7 = vector.load %arg4[%c0_1, %c0_2] : memref<32x128xbf16, #tpu.memory_space<vmem>>, vector<32x128xbf16>
    %cst = arith.constant dense<0.000000e+00> : vector<128x128xf32>
    %8 = tpu.matmul %6, %7, %cst {dimension_numbers = #tpu.dot_dimension_numbers<[1], [0], [0], [1], [0, 0, 1, 1], [], []>} : vector<128x32xbf16>, vector<32x128xbf16>, vector<128x128xf32> -> vector<128x128xf32>
    %c0_3 = arith.constant 0 : index
    %c0_4 = arith.constant 0 : index
    %9 = vector.load %arg5[%c0_3, %c0_4] : memref<1x128xf32, #tpu.memory_space<vmem>>, vector<1x128xf32>
    %10 = vector.broadcast %9 : vector<1x128xf32> to vector<128x128xf32>
    %11 = arith.addf %8, %10 : vector<128x128xf32>
    %c0_5 = arith.constant 0 : index
    %c0_6 = arith.constant 0 : index
    %12 = vector.load %arg3[%c0_5, %c0_6] : memref<256x128xi8, #tpu.memory_space<vmem>>, vector<256x128xi8>
    %13 = arith.sitofp %12 : vector<256x128xi8> to vector<256x128xbf16>
    %c0_7 = arith.constant 0 : index
    %c0_8 = arith.constant 0 : index
    %14 = vector.load %arg9[%c0_7, %c0_8] : memref<256x128xf32, #tpu.memory_space<vmem>>, vector<256x128xf32>
    %15 = arith.truncf %11 : vector<128x128xf32> to vector<128x128xbf16>
    %cst_9 = arith.constant dense<0.000000e+00> : vector<256x128xf32>
    %16 = tpu.matmul %13, %15, %cst_9 {dimension_numbers = #tpu.dot_dimension_numbers<[1], [0], [0], [1], [0, 0, 1, 1], [], []>} : vector<256x128xbf16>, vector<128x128xbf16>, vector<256x128xf32> -> vector<256x128xf32>
    %17 = arith.addf %14, %16 : vector<256x128xf32>
    %c0_10 = arith.constant 0 : index
    %c0_11 = arith.constant 0 : index
    %18 = vector.load %arg9[%c0_10, %c0_11] : memref<256x128xf32, #tpu.memory_space<vmem>>, vector<256x128xf32>
    tpu.vector_store %arg9[%c0_10, %c0_11], %17 {strides = array<i32>} : memref<256x128xf32, #tpu.memory_space<vmem>>, vector<256x128xf32>,
    %c3_i32 = arith.constant 3 : i32
    %19 = arith.cmpi eq, %arg1, %c3_i32 : i32
    %20 = arith.extui %19 : i1 to i32
    %c0_i32_12 = arith.constant 0 : i32
    %21 = arith.cmpi ne, %20, %c0_i32_12 : i32
    scf.if %21 {
      %c0_13 = arith.constant 0 : index
      %c0_14 = arith.constant 0 : index
      %22 = vector.load %arg9[%c0_13, %c0_14] : memref<256x128xf32, #tpu.memory_space<vmem>>, vector<256x128xf32>
      %23 = arith.truncf %22 : vector<256x128xf32> to vector<256x128xbf16>
      %c0_15 = arith.constant 0 : index
      %c0_16 = arith.constant 0 : index
      %24 = vector.load %arg6[%c0_15, %c0_16] : memref<128x128xbf16, #tpu.memory_space<vmem>>, vector<128x128xbf16>
      %cst_17 = arith.constant dense<0.000000e+00> : vector<256x128xf32>
      %25 = tpu.matmul %23, %24, %cst_17 {dimension_numbers = #tpu.dot_dimension_numbers<[1], [0], [0], [1], [0, 0, 1, 1], [], []>} : vector<256x128xbf16>, vector<128x128xbf16>, vector<256x128xf32> -> vector<256x128xf32>
      %c0_18 = arith.constant 0 : index
      %c0_19 = arith.constant 0 : index
      %26 = vector.load %arg7[%c0_18, %c0_19] : memref<1x128xf32, #tpu.memory_space<vmem>>, vector<1x128xf32>
      %27 = vector.broadcast %26 : vector<1x128xf32> to vector<256x128xf32>
      %28 = arith.addf %25, %27 : vector<256x128xf32>
      %c0_20 = arith.constant 0 : index
      %c0_21 = arith.constant 0 : index
      %29 = vector.load %arg8[%c0_20, %c0_21] : memref<256x128xf32, #tpu.memory_space<vmem>>, vector<256x128xf32>
      tpu.vector_store %arg8[%c0_20, %c0_21], %28 {strides = array<i32>} : memref<256x128xf32, #tpu.memory_space<vmem>>, vector<256x128xf32>,
    } else {
    }
    return
  }
  func.func @transform_0(%arg0: i32, %arg1: i32) -> (i32, i32) {
    %c0_i32 = arith.constant 0 : i32
    %c0_i32_0 = arith.constant 0 : i32
    %c0_i32_1 = arith.constant 0 : i32
    return %c0_i32, %c0_i32_0 : i32, i32
  }
  func.func @transform_1(%arg0: i32, %arg1: i32) -> (i32, i32) {
    %c0_i32 = arith.constant 0 : i32
    return %arg0, %arg1 : i32, i32
  }
  func.func @transform_2(%arg0: i32, %arg1: i32) -> (i32, i32) {
    %c0_i32 = arith.constant 0 : i32
    %c0_i32_0 = arith.constant 0 : i32
    %c0_i32_1 = arith.constant 0 : i32
    return %c0_i32, %c0_i32_0 : i32, i32
  }
  func.func @transform_3(%arg0: i32, %arg1: i32) -> (i32, i32) {
    %c0_i32 = arith.constant 0 : i32
    %c0_i32_0 = arith.constant 0 : i32
    %c0_i32_1 = arith.constant 0 : i32
    return %c0_i32, %c0_i32_0 : i32, i32
  }
  func.func @transform_4(%arg0: i32, %arg1: i32) -> (i32, i32) {
    %c0_i32 = arith.constant 0 : i32
    %c0_i32_0 = arith.constant 0 : i32
    %c0_i32_1 = arith.constant 0 : i32
    return %c0_i32, %c0_i32_0 : i32, i32
  }
  func.func @transform_5(%arg0: i32, %arg1: i32) -> (i32, i32) {
    %c0_i32 = arith.constant 0 : i32
    %c0_i32_0 = arith.constant 0 : i32
    %c0_i32_1 = arith.constant 0 : i32
    return %c0_i32, %c0_i32_0 : i32, i32
  }
  func.func @transform_6(%arg0: i32, %arg1: i32) -> (i32, i32) {
    %c0_i32 = arith.constant 0 : i32
    %c0_i32_0 = arith.constant 0 : i32
    return %arg0, %c0_i32 : i32, i32
  }
}

</mosaic_0001>

<bundles_post_ra>
// kernel: tpu_custom_call.1
= control target key start
LH: loop header
LB: loop body
LE: loop exit
PB: predicated region body
PF: predicated region fallthrough
CT: control target
= control target key end

     0   :  { %s2145_s0 = inlined_call_operand.vmem [shape: bf16[512,32], index: 0, kind: input, shape index: {}]   ;;  %s2146_s1 = inlined_call_operand.hbm [shape: s8[512,512], index: 1, kind: input, shape index: {}]   ;;  %s2147_s2 = inlined_call_operand.vmem [shape: bf16[32,128], index: 2, kind: input, shape index: {}]   ;;  %s2148_s3 = inlined_call_operand.vmem [shape: f32[1,128], index: 3, kind: input, shape index: {}]   ;;  %s2149_s4 = inlined_call_operand.vmem [shape: bf16[128,128], index: 4, kind: input, shape index: {}]   ;;  %s2150_s5 = inlined_call_operand.vmem [shape: f32[1,128], index: 5, kind: input, shape index: {}]   ;;  %s2151_s6 = inlined_call_operand.hbm [shape: f32[512,128], index: 6, kind: output, shape index: {}]  }
   0x1   :  { %2158 = sst [smem:[#allocation15_spill]] %s2151_s6 }
   0x2   :  { %11 = vsyncpa [#allocation4], 0 }
   0x3   :  { %13 = vsyncpa [#allocation4 + $0x1], 0 }
   0x4   :  { %14 = vsyncpa [#allocation5], 0 }
   0x5   :  { %16 = vsyncpa [#allocation5 + $0x1], 0  ;;  %s1813_s21 = smov 0   ;;  %s1815_s22 = smov 0  }
   0x6   :  { %s1817_s23 = smov 0   ;;  %s1819_s24 = smov 0  }
   0x7   :  { %s1821_s25 = smov 0   ;;  %s1823_s26 = smov 0  }
   0x8   :  { %s1825_s27 = smov 0   ;;  %s1827_s28 = smov 0  }
   0x9   :  { %s1829_s29 = smov 0   ;;  %s1831_s30 = smov 0  }
   0xa   :  { %s1833_s7 = smov 0  }
   0xb LB: > { %2159 = sst [smem:[#allocation9_spill]] %s1748_s26  ;;  %s1238_s8 = sadd.s32 4294967295, %s1768_s7   ;;  %s1768_s7 = sphi %s1833_s7, %s22_s7   ;;  %s1764_s30 = sphi %s1831_s30, %s2185_s30   ;;  %s1760_s29 = sphi %s1829_s29, %s2184_s29   ;;  %s1756_s28 = sphi %s1827_s28, %s2183_s28   ;;  %s1752_s27 = sphi %s1825_s27, %s2182_s27   ;;  %s1748_s26 = sphi %s1823_s26, %s2174_s26   ;;  %s1744_s25 = sphi %s1821_s25, %s2181_s25   ;;  %s1740_s24 = sphi %s1819_s24, %s2180_s24   ;;  %s1736_s23 = sphi %s1817_s23, %s2179_s23   ;;  %s1732_s22 = sphi %s1815_s22, %s2178_s22   ;;  %s1728_s21 = sphi %s1813_s21, %s2177_s21  }
   0xc   : > { %2160 = sst [smem:[#allocation10_spill]] %s1756_s28  ;;  %s1239_s9 = sadd.s32 4294967294, %s1768_s7  }
   0xd   : > { %s31_s10 = sadd.s32 1, %s1760_s29  ;;  %s34_s11 = sadd.s32 1, %s1764_s30 }
   0xe   : > { %p32_p0 = scmp.ge.s32.totalorder %s31_s10, 4  ;;  %s64_s12 = sadd.s32 1, %s1748_s26 }
   0xf   : > { %p71_p1 = scmp.ne.s32.totalorder %s1748_s26, %s1744_s25  ;;  %p72_p2 = scmp.eq.s32.totalorder %s1768_s7, 0 }
  0x10   : > { %s2187_s10 = smov (%p32_p0, %s31_s10), 0  ;;  %s2189_s11 = smov (!%p32_p0, %s34_s11), %s1764_s30 }
  0x11   : > { %2161 = sst [smem:[#allocation11_spill]] %s2187_s10  ;;  %s60_s13 = ssub.s32 %s1760_s29, %s2187_s10 }
  0x12   : > { %p1879_p3 = por %p72_p2, %p71_p1  ;;  %p36_p4 = scmp.ge.s32.totalorder %s2189_s11, 2 }
  0x13   : > { %p77_p5 = scmp.ne.s32.totalorder %s1744_s25, %s1740_s24  ;;  %p78_p6 = scmp.eq.s32.totalorder %s1238_s8, 0 }
  0x14   : > { %s174_s15 = sadd.s32 1, %s1736_s23  ;;  %s2191_s11 = smov (%p36_p4, %s2189_s11), 0 }
  0x15   : > { %2163 = sst [smem:[#allocation12_spill]] %s2191_s11  ;;  %p1887_p7 = por %p78_p6, %p77_p5 }
  0x16   : > { %p184_p8 = scmp.ne.s32.totalorder %s1736_s23, %s1732_s22  ;;  %s59_s17 = ssub.s32 %s1764_s30, %s2191_s11 }
  0x17   : > { %p185_p9 = scmp.eq.s32.totalorder %s1238_s8, 7  ;;  %s61_s18 = sor.u32 %s60_s13, %s59_s17 }
  0x18   : > { %p172_p10 = scmp.eq.s32.totalorder %s59_s17, 0  ;;  %p62_p11 = scmp.eq.s32.totalorder %s61_s18, 0 }
  0x19   : > { %p1895_p12 = por %p185_p9, %p184_p8  ;;  %p190_p13 = scmp.ne.s32.totalorder %s1732_s22, %s1728_s21 }
  0x1a   : > { %s1900_s20 = scalar_select %p172_p10, %s1736_s23, %s174_s15  }
  0x1b   : > { %s2165_s19 = scalar_select %p1895_p12, 1, 0 }
  0x1c   : > { %s1903_s24 = scalar_select %p62_p11, %s1748_s26, %s64_s12  }
  0x1d   : > { %2166 = sst [smem:[#allocation13_spill]] %s2165_s19  ;;  %p191_p0 = scmp.eq.s32.totalorder %s1239_s9, 7 }
  0x1e   : > { %2167 = sst [smem:[#allocation14_spill]] %s1903_s24  ;;  %p1506_p1 = scmp.lt.s32.totalorder %s1768_s7, 8 }
  0x1f   : > { %p1908_p2 = por %p191_p0, %p190_p13  ;;  %s226_s8 = sand.u32 1, %s1748_s26  }
  0x20   : > { %s1242_s13 = sshll.u32 %s226_s8, 6  ;;  %s1286_s17 = sshll.u32 %s1764_s30, 5 }
  0x21   : > { %s236_s18 = sadd.s32 %s1760_s29, %s1286_s17  ;;  %s230_s11 = scalar_lea.vmem [#allocation3], %s1242_s13 }
  0x22   : > { %s239_s6 = sshll.u32 %s230_s11, 4  ;;  %s1245_s28 = sshll.u32 %s236_s18, 7  ;;  %s240_s6 = int_to_ptr.vmem [resolvable:$true] %s239_s6 }
  0x23   : > { %s238_s12 = scalar_lea.hbm %s2146_s1, %s1245_s28  ;;  %p1920_p4 = pnand %p1506_p1, %p1879_p3 }
  0x24   : > { %s227_s24 = scalar_lea.sflag [#allocation4], %s226_s8  ;;  %s1633_s26 = scalar_lea.vmem %s240_s6, 1024 }
  0x25   : > { %p1622_p5 = pneg %p1920_p4  ;;  %p1634_p6 = scmp.ne.s32.totalorder %s240_s6, %s1633_s26 }
  0x26   : > { %s1770_s11 = smov [#allocation3]  }
  0x27   : > { %p1636_p8 = pnand %p1634_p6, %p1622_p5  ;;  %s1638_s13 = sshll.u32 %s1770_s11, 4  ;;  %s1639_s13 = int_to_ptr.vmem [resolvable:$false] %s1638_s13 }
  0x28   : > { %s1640_s17 = scalar_lea.vmem %s1639_s13, 2048  ;;  %p1641_p10 = scmp.lt.s32.totalorder %s240_s6, %s1639_s13 }
  0x29   : > { %p1637_p9 = pneg %p1636_p8  ;;  %p1642_p11 = scmp.lt.s32.totalorder %s1640_s17, %s1633_s26 }
  0x2b   : > { %p1643_p13 = por %p1642_p11, %p1641_p10 }
  0x2d   : > { %p1644_p0 = pnand %p1643_p13, %p1637_p9 }
  0x2f   : > { %1647 = shalt.err (!%p1644_p0)
}
  0x30   : > { %s1771_s28 = smov 512   ;;  %s1772_s14 = smov 128  }
  0x31   : > { %s1773_s19 = smov 8   ;;  %p1246_p3 = scmp.ge.s32.totalorder %s1768_s7, 1 }
  0x32   : > { %1501 = dma.hbm_to_vmem [thread:$0]  (!%p1920_p4), %s238_s12, 1024, %s240_s6, %s227_s24, %s1771_s28, %s1772_s14, %s1773_s19  }
  0x33   : > { %p247_p1 = scmp.lt.s32.totalorder %s1768_s7, 9 }
  0x35   : > { %p248_p5 = pnand %p1246_p3, %p247_p1 }
  0x36   : > { %s253_s8 = sand.u32 (!%p248_p5), 1, %s1744_s25  }
  0x37   : > { %251 = sbr.rel (%p248_p5) target bundleno = 869 (0x365), region = 44  ;;  %s1247_s18 = sshll.u32 (!%p248_p5), %s253_s8, 6 }
  0x38   : > { %s254_s26 = scalar_lea.sflag (!%p248_p5), [#allocation4], %s253_s8  ;;  %s1931_s15 = scalar_lea.vmem (!%p248_p5), [#allocation3], %s1247_s18 }
  0x3c   : > { %1719 = dma.done.wait (%p1887_p7), %s254_s26, 1024  }
  0x3d   : > { %1721 = vsyncadd (%p1887_p7), %s254_s26, 4294966272  ;;  %s283_s9 = sand.u32 1, %s1732_s22   ;;  %p1249_p4 = scmp.ne.s32.totalorder %s1752_s27, 0 }
  0x3e   : > { %s1248_s6 = sshll.u32 %s283_s9, 8 }
  0x3f   : > { %s1940_s24 = scalar_lea.vmem [#allocation6], %s1248_s6  ;;  %292 = sbr.rel (%p1249_p4) target bundleno = 85 (0x55), region = 52 }
  0x44   : > { %v1774_v0 = vmov 0.0  }
  0x45   : > { %293 = vst [vmem:[#allocation2 + $0xb0] sm:$0xff] %v1774_v0  ;;  %294 = vst [vmem:[#allocation2] sm:$0xff] %v1774_v0 }
  0x46   : > { %295 = vst [vmem:[#allocation2 + $0xd8] sm:$0xff] %v1774_v0  ;;  %296 = vst [vmem:[#allocation2 + $0x18] sm:$0xff] %v1774_v0 }
  0x47   : > { %297 = vst [vmem:[#allocation2 + $0x50] sm:$0xff] %v1774_v0  ;;  %298 = vst [vmem:[#allocation2 + $0x68] sm:$0xff] %v1774_v0 }
  0x48   : > { %299 = vst [vmem:[#allocation2 + $0x30] sm:$0xff] %v1774_v0  ;;  %300 = vst [vmem:[#allocation2 + $0x48] sm:$0xff] %v1774_v0 }
  0x49   : > { %301 = vst [vmem:[#allocation2 + $0x80] sm:$0xff] %v1774_v0  ;;  %302 = vst [vmem:[#allocation2 + $0x88] sm:$0xff] %v1774_v0 }
  0x4a   : > { %303 = vst [vmem:[#allocation2 + $0xe8] sm:$0xff] %v1774_v0  ;;  %304 = vst [vmem:[#allocation2 + $0xb8] sm:$0xff] %v1774_v0 }
  0x4b   : > { %305 = vst [vmem:[#allocation2 + $0x60] sm:$0xff] %v1774_v0  ;;  %306 = vst [vmem:[#allocation2 + $0xf0] sm:$0xff] %v1774_v0 }
  0x4c   : > { %307 = vst [vmem:[#allocation2 + $0x8] sm:$0xff] %v1774_v0  ;;  %308 = vst [vmem:[#allocation2 + $0x78] sm:$0xff] %v1774_v0 }
  0x4d   : > { %309 = vst [vmem:[#allocation2 + $0x38] sm:$0xff] %v1774_v0  ;;  %310 = vst [vmem:[#allocation2 + $0x58] sm:$0xff] %v1774_v0 }
  0x4e   : > { %311 = vst [vmem:[#allocation2 + $0x40] sm:$0xff] %v1774_v0  ;;  %312 = vst [vmem:[#allocation2 + $0xc8] sm:$0xff] %v1774_v0 }
  0x4f   : > { %313 = vst [vmem:[#allocation2 + $0xe0] sm:$0xff] %v1774_v0  ;;  %314 = vst [vmem:[#allocation2 + $0x90] sm:$0xff] %v1774_v0 }
  0x50   : > { %315 = vst [vmem:[#allocation2 + $0x70] sm:$0xff] %v1774_v0  ;;  %316 = vst [vmem:[#allocation2 + $0xc0] sm:$0xff] %v1774_v0 }
  0x51   : > { %317 = vst [vmem:[#allocation2 + $0xa8] sm:$0xff] %v1774_v0  ;;  %318 = vst [vmem:[#allocation2 + $0xd0] sm:$0xff] %v1774_v0 }
  0x52   : > { %319 = vst [vmem:[#allocation2 + $0x10] sm:$0xff] %v1774_v0  ;;  %320 = vst [vmem:[#allocation2 + $0x28] sm:$0xff] %v1774_v0 }
  0x53   : > { %321 = vst [vmem:[#allocation2 + $0xa0] sm:$0xff] %v1774_v0  ;;  %322 = vst [vmem:[#allocation2 + $0xf8] sm:$0xff] %v1774_v0 }
  0x54   : > { %323 = vst [vmem:[#allocation2 + $0x20] sm:$0xff] %v1774_v0  ;;  %324 = vst [vmem:[#allocation2 + $0x98] sm:$0xff] %v1774_v0 }
  0x55 PF: > { %v1602_v1 = vld [vmem:[%s2147_s2 + $0x8] sm:$0xff]   ;;  %s1250_s11 = sshll.u32 %s1752_s27, 7  ;;  %v1603_v2 = vld [vmem:[%s2147_s2] sm:$0xff]   ;;  %vm409_vm0 = vcmask 261120   ;;  %v1962_v11 = vld [vmem:[%s1931_s15 + $0x18] sm:$0xff]  ;;  %p1271_p7 = scmp.ne.s32.totalorder %s1752_s27, 3 }
  0x56   : > { %s326_s28 = sshra.s32 %s1250_s11, 3  ;;  %1346 = vmatprep.subr.bf16.mxu0 %v1602_v1  ;;  %v545_v12 = vunpack.c.l.s8.bf16 %v1962_v11  ;;  %v1966_v13 = vld [vmem:[%s1931_s15] sm:$0xff]  ;;  %v532_v57 = vld [vmem:[%s1931_s15 + $0x8] sm:$0xff]  ;;  %v546_v58 = vunpack.c.h.s8.bf16 %v1962_v11  ;;  %v533_v63 = vld [vmem:[%s1931_s15 + $0x10] sm:$0xff] }
  0x57   : > { %s1251_s14 = sshll.u32 %s326_s28, 2  ;;  %1347 = vmatpush3.bf16.msra.mxu0 %v1602_v1  ;;  %v539_v14 = vunpack.c.l.s8.bf16 %v1966_v13  ;;  %v1252_v29 = vld [vmem:[%s2148_s3] ss:$0 sm:$0xff]  ;;  %v540_v59 = vunpack.c.h.s8.bf16 %v1966_v13  ;;  %v541_v61 = vunpack.c.l.s8.bf16 %v532_v57  ;;  %v536_v62 = vld [vmem:[%s1931_s15 + $0x28] sm:$0xff]  ;;  %v542_v1 = vunpack.c.h.s8.bf16 %v532_v57  ;;  %v557_v13 = vld [vmem:[#allocation2 + $0xd8] sm:$0xff] }
  0x58   : > { %s329_s18 = scalar_lea.vmem %s2145_s0, %s1251_s14  ;;  %1348 = vmatprep.subr.bf16.mxu0 %v1603_v2  ;;  %1394 = vmatprep.mubr.bf16.mxu1 %v545_v12  ;;  %v535_v56 = vld [vmem:[%s1931_s15 + $0x20] sm:$0xff]  ;;  %v569_v12 = vld [vmem:[#allocation2 + $0x8] sm:$0xff]  ;;  %v577_v57 = vld [vmem:[#allocation2 + $0x70] sm:$0xff] }
  0x59   : > { %v1604_v3 = vld [vmem:[%s329_s18] sm:$0xff]   ;;  %v1605_v4 = vld [vmem:[%s329_s18 + $0x8] sm:$0xff]   ;;  %v1606_v5 = vld [vmem:[%s329_s18 + $0x10] sm:$0xff]   ;;  %v547_v60 = vunpack.c.l.s8.bf16 %v535_v56  ;;  %v548_v0 = vunpack.c.h.s8.bf16 %v535_v56 }
  0x5a   : > { %1350 = vmatprep.mubr.msk.bf16.mxu0 %vm409_vm0, %v1604_v3  ;;  %v1607_v6 = vld [vmem:[%s329_s18 + $0x18] sm:$0xff]   ;;  %v1608_v7 = vld [vmem:[%s329_s18 + $0x20] sm:$0xff]   ;;  %v1609_v8 = vld [vmem:[%s329_s18 + $0x28] sm:$0xff]   ;;  %v543_v3 = vunpack.c.l.s8.bf16 %v533_v63 }
  0x5b   : > { %1349 = vmatpush3.bf16.msra.mxu0 %v1603_v2  ;;  %v1610_v9 = vld [vmem:[%s329_s18 + $0x30] sm:$0xff]   ;;  %v1611_v10 = vld [vmem:[%s329_s18 + $0x38] sm:$0xff]   ;;  %v549_v2 = vunpack.c.l.s8.bf16 %v536_v62 }
  0x5e   : > { %1351 = vmatmul.mubr.msk.bf16.vlgmr.msra.gmra.mxu0 %vm409_vm0, %v1605_v4  ;;  %v537_v4 = vld [vmem:[%s1931_s15 + $0x30] sm:$0xff] }
  0x5f   : > { %1354 = vmatprep.mubr.msk.bf16.mxu0 %vm409_vm0, %v1606_v5  ;;  %v550_v5 = vunpack.c.h.s8.bf16 %v536_v62 }
  0x66   : > { %1355 = vmatmul.mubr.msk.bf16.gmra.mxu0 %vm409_vm0, %v1607_v6  ;;  %v544_v6 = vunpack.c.h.s8.bf16 %v533_v63  ;;  %v575_v63 = vld [vmem:[#allocation2 + $0xe0] sm:$0xff] }
  0x67   : > { %1358 = vmatprep.mubr.msk.bf16.mxu0 %vm409_vm0, %v1608_v7  ;;  %v551_v7 = vunpack.c.l.s8.bf16 %v537_v4 }
  0x6e   : > { %1359 = vmatmul.mubr.msk.bf16.gmra.mxu0 %vm409_vm0, %v1609_v8  ;;  %v538_v8 = vld [vmem:[%s1931_s15 + $0x38] sm:$0xff] }
  0x6f   : > { %1362 = vmatprep.mubr.msk.bf16.mxu0 %vm409_vm0, %v1610_v9  ;;  %v552_v9 = vunpack.c.h.s8.bf16 %v537_v4  ;;  %v554_v11 = vunpack.c.h.s8.bf16 %v538_v8 }
  0x76   : > { %1363 = vmatmul.mubr.msk.bf16.gmra.mxu0 %vm409_vm0, %v1611_v10  ;;  %v553_v10 = vunpack.c.l.s8.bf16 %v538_v8 }
  0x77   : > { %1382 = vmatprep.mubr.bf16.mxu0 %v539_v14 }
 0x11e   : > { %v1352_v15 = vpop.f32.mrf.mxu0 }
 0x11f   : > { %v477_v51 = vadd.f32 %v1352_v15, %v1252_v29  ;;  %v567_v15 = vld [vmem:[#allocation2 + $0x60] sm:$0xff] }
 0x120   : > { %v468_v16 = vpop.f32.mrf.mxu0 }
 0x121   : > { %v469_v54 = vadd.f32 %v1252_v29, %v468_v16 }
 0x122   : > { %v1353_v17 = vpop.f32.mrf.mxu0 }
 0x123   : > { %v480_v49 = vadd.f32 %v1353_v17, %v1252_v29  ;;  %v555_v17 = vld [vmem:[#allocation2 + $0xb0] sm:$0xff] }
 0x124   : > { %v471_v18 = vpop.f32.mrf.mxu0 }
 0x125   : > { %v588_v52 = vpack.c.bf16 %v480_v49, %v477_v51  ;;  %v472_v53 = vadd.f32 %v1252_v29, %v471_v18  ;;  %v572_v51 = vld [vmem:[#allocation2 + $0x58] sm:$0xff] }
 0x126   : > { %v1356_v19 = vpop.f32.mrf.mxu0 }
 0x127   : > { %v493_v45 = vadd.f32 %v1356_v19, %v1252_v29  ;;  %v587_v55 = vpack.c.bf16 %v472_v53, %v469_v54  ;;  %v560_v53 = vld [vmem:[#allocation2 + $0x68] sm:$0xff] }
 0x128   : > { %v484_v20 = vpop.f32.mrf.mxu0 }
 0x129   : > { %v485_v48 = vadd.f32 %v1252_v29, %v484_v20 }
 0x12a   : > { %v1357_v21 = vpop.f32.mrf.mxu0 }
 0x12b   : > { %v496_v43 = vadd.f32 %v1357_v21, %v1252_v29  ;;  %v570_v21 = vld [vmem:[#allocation2 + $0x78] sm:$0xff] }
 0x12c   : > { %v487_v22 = vpop.f32.mrf.mxu0 }
 0x12d   : > { %v590_v46 = vpack.c.bf16 %v496_v43, %v493_v45  ;;  %v488_v47 = vadd.f32 %v1252_v29, %v487_v22  ;;  %v574_v45 = vld [vmem:[#allocation2 + $0xc8] sm:$0xff] }
 0x12e   : > { %v1360_v23 = vpop.f32.mrf.mxu0 }
 0x12f   : > { %v509_v39 = vadd.f32 %v1360_v23, %v1252_v29  ;;  %v589_v50 = vpack.c.bf16 %v488_v47, %v485_v48  ;;  %v558_v23 = vld [vmem:[#allocation2 + $0x18] sm:$0xff]  ;;  %v562_v47 = vld [vmem:[#allocation2 + $0x48] sm:$0xff] }
 0x130   : > { %v500_v24 = vpop.f32.mrf.mxu0 }
 0x131   : > { %v501_v42 = vadd.f32 %v1252_v29, %v500_v24 }
 0x132   : > { %v1361_v25 = vpop.f32.mrf.mxu0 }
 0x133   : > { %v512_v37 = vadd.f32 %v1361_v25, %v1252_v29 }
 0x134   : > { %v503_v26 = vpop.f32.mrf.mxu0 }
 0x135   : > { %v592_v40 = vpack.c.bf16 %v512_v37, %v509_v39  ;;  %v504_v41 = vadd.f32 %v1252_v29, %v503_v26  ;;  %v571_v39 = vld [vmem:[#allocation2 + $0x38] sm:$0xff] }
 0x136   : > { %v1364_v27 = vpop.f32.mrf.mxu0 }
 0x137   : > { %v525_v31 = vadd.f32 %v1364_v27, %v1252_v29  ;;  %v591_v44 = vpack.c.bf16 %v504_v41, %v501_v42  ;;  %v568_v27 = vld [vmem:[#allocation2 + $0xf0] sm:$0xff] }
 0x138   : > { %v516_v28 = vpop.f32.mrf.mxu0  ;;  %v559_v41 = vld [vmem:[#allocation2 + $0x50] sm:$0xff] }
 0x139   : > { %v517_v34 = vadd.f32 %v1252_v29, %v516_v28 }
 0x13a   : > { %v1365_v30 = vpop.f32.mrf.mxu0 }
 0x13b   : > { %v528_v32 = vadd.f32 %v1365_v30, %v1252_v29 }
 0x13c   : > { %v519_v33 = vpop.f32.mrf.mxu0 }
 0x13d   : > { %v594_v35 = vpack.c.bf16 %v528_v32, %v525_v31  ;;  %v520_v36 = vadd.f32 %v1252_v29, %v519_v33  ;;  %v556_v29 = vld [vmem:[#allocation2] sm:$0xff] }
 0x13e   : > { %v573_v33 = vld [vmem:[#allocation2 + $0x40] sm:$0xff] }
 0x13f   : > { %v593_v38 = vpack.c.bf16 %v520_v36, %v517_v34  ;;  %1366 = vmatprep.subr.bf16.mxu0 %v594_v35  ;;  %1462 = vmatprep.subr.bf16.mxu1 %v594_v35 }
 0x140   : > { %1367 = vmatpush3.bf16.msra.mxu0 %v594_v35  ;;  %1470 = vmatpush3.bf16.msra.mxu1 %v594_v35  ;;  %v561_v35 = vld [vmem:[#allocation2 + $0x30] sm:$0xff] }
 0x141   : > { %1368 = vmatprep.subr.bf16.mxu0 %v593_v38  ;;  %1463 = vmatprep.subr.bf16.mxu1 %v593_v38 }
 0x144   : > { %1369 = vmatpush3.bf16.msra.mxu0 %v593_v38  ;;  %1471 = vmatpush3.bf16.msra.mxu1 %v593_v38 }
 0x145   : > { %1370 = vmatprep.subr.bf16.mxu0 %v592_v40  ;;  %1464 = vmatprep.subr.bf16.mxu1 %v592_v40 }
 0x148   : > { %1371 = vmatpush3.bf16.msra.mxu0 %v592_v40  ;;  %1472 = vmatpush3.bf16.msra.mxu1 %v592_v40 }
 0x149   : > { %1372 = vmatprep.subr.bf16.mxu0 %v591_v44  ;;  %1465 = vmatprep.subr.bf16.mxu1 %v591_v44 }
 0x14c   : > { %1373 = vmatpush3.bf16.msra.mxu0 %v591_v44  ;;  %1473 = vmatpush3.bf16.msra.mxu1 %v591_v44 }
 0x14d   : > { %1374 = vmatprep.subr.bf16.mxu0 %v590_v46  ;;  %1466 = vmatprep.subr.bf16.mxu1 %v590_v46 }
 0x150   : > { %1375 = vmatpush3.bf16.msra.mxu0 %v590_v46  ;;  %1474 = vmatpush3.bf16.msra.mxu1 %v590_v46 }
 0x151   : > { %1376 = vmatprep.subr.bf16.mxu0 %v589_v50  ;;  %1467 = vmatprep.subr.bf16.mxu1 %v589_v50 }
 0x154   : > { %1377 = vmatpush3.bf16.msra.mxu0 %v589_v50  ;;  %1475 = vmatpush3.bf16.msra.mxu1 %v589_v50 }
 0x155   : > { %1378 = vmatprep.subr.bf16.mxu0 %v588_v52  ;;  %1468 = vmatprep.subr.bf16.mxu1 %v588_v52 }
 0x158   : > { %1379 = vmatpush3.bf16.msra.mxu0 %v588_v52  ;;  %1476 = vmatpush3.bf16.msra.mxu1 %v588_v52 }
 0x159   : > { %1380 = vmatprep.subr.bf16.mxu0 %v587_v55  ;;  %1469 = vmatprep.subr.bf16.mxu1 %v587_v55 }
 0x15c   : > { %1381 = vmatpush3.bf16.msra.mxu0 %v587_v55  ;;  %1477 = vmatpush3.bf16.msra.mxu1 %v587_v55 }
 0x15f   : > { %1395 = vmatmul.mubr.bf16.vlgmr.msra.gmra.mxu1 %v546_v58  ;;  %1383 = vmatmul.mubr.bf16.vlgmr.msra.gmra.mxu0 %v540_v59  ;;  %v565_v59 = vld [vmem:[#allocation2 + $0xe8] sm:$0xff] }
 0x160   : > { %1398 = vmatprep.mubr.bf16.mxu1 %v547_v60  ;;  %1386 = vmatprep.mubr.bf16.mxu0 %v541_v61 }
 0x167   : > { %1399 = vmatmul.mubr.bf16.gmra.mxu1 %v548_v0  ;;  %1387 = vmatmul.mubr.bf16.gmra.mxu0 %v542_v1  ;;  %v563_v1 = vld [vmem:[#allocation2 + $0x80] sm:$0xff] }
 0x168   : > { %1402 = vmatprep.mubr.bf16.mxu1 %v549_v2  ;;  %1390 = vmatprep.mubr.bf16.mxu0 %v543_v3 }
 0x16f   : > { %1403 = vmatmul.mubr.bf16.gmra.mxu1 %v550_v5  ;;  %1391 = vmatmul.mubr.bf16.gmra.mxu0 %v544_v6  ;;  %v578_v5 = vld [vmem:[#allocation2 + $0xc0] sm:$0xff] }
 0x170   : > { %1406 = vmatprep.mubr.bf16.mxu1 %v551_v7  ;;  %v566_v7 = vld [vmem:[#allocation2 + $0xb8] sm:$0xff] }
 0x177   : > { %1407 = vmatmul.mubr.bf16.gmra.mxu1 %v552_v9 }
 0x178   : > { %1410 = vmatprep.mubr.bf16.mxu1 %v553_v10 }
 0x17f   : > { %1411 = vmatmul.mubr.bf16.gmra.mxu1 %v554_v11  ;;  %v576_v11 = vld [vmem:[#allocation2 + $0x90] sm:$0xff] }
 0x21f   : > { %v1396_v14 = vpop.f32.mrf.mxu1  ;;  %v1384_v16 = vpop.f32.mrf.mxu0 }
 0x220   : > { %v770_v18 = vadd.f32 %v1396_v14, %v569_v12  ;;  %v758_v19 = vadd.f32 %v1384_v16, %v557_v13  ;;  %v564_v13 = vld [vmem:[#allocation2 + $0x88] sm:$0xff] }
 0x221   : > { %v677_v20 = vpop.f32.mrf.mxu1  ;;  %v629_v22 = vpop.f32.mrf.mxu0 }
 0x222   : > { %802 = vst [vmem:[#allocation2 + $0x8] sm:$0xff] %v770_v18  ;;  %v768_v24 = vadd.f32 %v677_v20, %v567_v15  ;;  %790 = vst [vmem:[#allocation2 + $0xd8] sm:$0xff] %v758_v19  ;;  %v756_v25 = vadd.f32 %v629_v22, %v555_v17  ;;  %v581_v17 = vld [vmem:[#allocation2 + $0x10] sm:$0xff]  ;;  %v579_v22 = vld [vmem:[#allocation2 + $0xa8] sm:$0xff] }
 0x223   : > { %v1397_v26 = vpop.f32.mrf.mxu1  ;;  %v1385_v28 = vpop.f32.mrf.mxu0 }
 0x224   : > { %800 = vst [vmem:[#allocation2 + $0x60] sm:$0xff] %v768_v24  ;;  %v771_v30 = vadd.f32 %v1397_v26, %v570_v21  ;;  %788 = vst [vmem:[#allocation2 + $0xb0] sm:$0xff] %v756_v25  ;;  %v759_v31 = vadd.f32 %v1385_v28, %v558_v23  ;;  %v582_v25 = vld [vmem:[#allocation2 + $0x28] sm:$0xff]  ;;  %v580_v28 = vld [vmem:[#allocation2 + $0xd0] sm:$0xff] }
 0x225   : > { %v680_v32 = vpop.f32.mrf.mxu1  ;;  %v632_v34 = vpop.f32.mrf.mxu0 }
 0x226   : > { %803 = vst [vmem:[#allocation2 + $0x78] sm:$0xff] %v771_v30  ;;  %v769_v36 = vadd.f32 %v680_v32, %v568_v27  ;;  %791 = vst [vmem:[#allocation2 + $0x18] sm:$0xff] %v759_v31  ;;  %v757_v37 = vadd.f32 %v632_v34, %v556_v29  ;;  %v585_v31 = vld [vmem:[#allocation2 + $0x20] sm:$0xff] }
 0x227   : > { %v1400_v38 = vpop.f32.mrf.mxu1  ;;  %v1388_v40 = vpop.f32.mrf.mxu0  ;;  %v583_v34 = vld [vmem:[#allocation2 + $0xa0] sm:$0xff] }
 0x228   : > { %801 = vst [vmem:[#allocation2 + $0xf0] sm:$0xff] %v769_v36  ;;  %v774_v42 = vadd.f32 %v1400_v38, %v573_v33  ;;  %789 = vst [vmem:[#allocation2] sm:$0xff] %v757_v37  ;;  %v762_v43 = vadd.f32 %v1388_v40, %v561_v35  ;;  %v586_v37 = vld [vmem:[#allocation2 + $0x98] sm:$0xff] }
 0x229   : > { %v693_v44 = vpop.f32.mrf.mxu1  ;;  %v645_v46 = vpop.f32.mrf.mxu0  ;;  %v584_v40 = vld [vmem:[#allocation2 + $0xf8] sm:$0xff] }
 0x22a   : > { %806 = vst [vmem:[#allocation2 + $0x40] sm:$0xff] %v774_v42  ;;  %v772_v48 = vadd.f32 %v693_v44, %v571_v39  ;;  %794 = vst [vmem:[#allocation2 + $0x30] sm:$0xff] %v762_v43  ;;  %v760_v49 = vadd.f32 %v645_v46, %v559_v41 }
 0x22b   : > { %v1401_v50 = vpop.f32.mrf.mxu1  ;;  %v1389_v52 = vpop.f32.mrf.mxu0 }
 0x22c   : > { %804 = vst [vmem:[#allocation2 + $0x38] sm:$0xff] %v772_v48  ;;  %v775_v54 = vadd.f32 %v1401_v50, %v574_v45  ;;  %792 = vst [vmem:[#allocation2 + $0x50] sm:$0xff] %v760_v49  ;;  %v763_v55 = vadd.f32 %v1389_v52, %v562_v47 }
 0x22d   : > { %v696_v56 = vpop.f32.mrf.mxu1  ;;  %v648_v58 = vpop.f32.mrf.mxu0 }
 0x22e   : > { %807 = vst [vmem:[#allocation2 + $0xc8] sm:$0xff] %v775_v54  ;;  %v773_v60 = vadd.f32 %v696_v56, %v572_v51  ;;  %795 = vst [vmem:[#allocation2 + $0x48] sm:$0xff] %v763_v55  ;;  %v761_v61 = vadd.f32 %v648_v58, %v560_v53 }
 0x22f   : > { %v1404_v62 = vpop.f32.mrf.mxu1  ;;  %v1392_v0 = vpop.f32.mrf.mxu0 }
 0x230   : > { %805 = vst [vmem:[#allocation2 + $0x58] sm:$0xff] %v773_v60  ;;  %v778_v2 = vadd.f32 %v1404_v62, %v577_v57  ;;  %793 = vst [vmem:[#allocation2 + $0x68] sm:$0xff] %v761_v61  ;;  %v766_v3 = vadd.f32 %v1392_v0, %v565_v59 }
 0x231   : > { %v709_v4 = vpop.f32.mrf.mxu1  ;;  %v661_v6 = vpop.f32.mrf.mxu0 }
 0x232   : > { %810 = vst [vmem:[#allocation2 + $0x70] sm:$0xff] %v778_v2  ;;  %v776_v8 = vadd.f32 %v709_v4, %v575_v63  ;;  %798 = vst [vmem:[#allocation2 + $0xe8] sm:$0xff] %v766_v3  ;;  %v764_v9 = vadd.f32 %v661_v6, %v563_v1 }
 0x233   : > { %v1405_v10 = vpop.f32.mrf.mxu1  ;;  %v1393_v12 = vpop.f32.mrf.mxu0 }
 0x234   : > { %808 = vst [vmem:[#allocation2 + $0xe0] sm:$0xff] %v776_v8  ;;  %v779_v14 = vadd.f32 %v1405_v10, %v578_v5  ;;  %796 = vst [vmem:[#allocation2 + $0x80] sm:$0xff] %v764_v9  ;;  %v767_v15 = vadd.f32 %v1393_v12, %v566_v7 }
 0x235   : > { %v712_v16 = vpop.f32.mrf.mxu1  ;;  %v664_v18 = vpop.f32.mrf.mxu0 }
 0x236   : > { %811 = vst [vmem:[#allocation2 + $0xc0] sm:$0xff] %v779_v14  ;;  %v777_v19 = vadd.f32 %v712_v16, %v576_v11  ;;  %799 = vst [vmem:[#allocation2 + $0xb8] sm:$0xff] %v767_v15  ;;  %v765_v20 = vadd.f32 %v664_v18, %v564_v13 }
 0x237   : > { %v1408_v21 = vpop.f32.mrf.mxu1 }
 0x238   : > { %809 = vst [vmem:[#allocation2 + $0x90] sm:$0xff] %v777_v19  ;;  %v782_v23 = vadd.f32 %v1408_v21, %v581_v17  ;;  %797 = vst [vmem:[#allocation2 + $0x88] sm:$0xff] %v765_v20 }
 0x239   : > { %v725_v24 = vpop.f32.mrf.mxu1 }
 0x23a   : > { %814 = vst [vmem:[#allocation2 + $0x10] sm:$0xff] %v782_v23  ;;  %v780_v26 = vadd.f32 %v725_v24, %v579_v22 }
 0x23b   : > { %v1409_v27 = vpop.f32.mrf.mxu1 }
 0x23c   : > { %812 = vst [vmem:[#allocation2 + $0xa8] sm:$0xff] %v780_v26  ;;  %v783_v29 = vadd.f32 %v1409_v27, %v582_v25 }
 0x23d   : > { %v728_v30 = vpop.f32.mrf.mxu1 }
 0x23e   : > { %815 = vst [vmem:[#allocation2 + $0x28] sm:$0xff] %v783_v29  ;;  %v781_v32 = vadd.f32 %v728_v30, %v580_v28 }
 0x23f   : > { %v1412_v33 = vpop.f32.mrf.mxu1 }
 0x240   : > { %813 = vst [vmem:[#allocation2 + $0xd0] sm:$0xff] %v781_v32  ;;  %v786_v35 = vadd.f32 %v1412_v33, %v585_v31 }
 0x241   : > { %v741_v36 = vpop.f32.mrf.mxu1 }
 0x242   : > { %818 = vst [vmem:[#allocation2 + $0x20] sm:$0xff] %v786_v35  ;;  %v784_v38 = vadd.f32 %v741_v36, %v583_v34 }
 0x243   : > { %v1413_v39 = vpop.f32.mrf.mxu1 }
 0x244   : > { %816 = vst [vmem:[#allocation2 + $0xa0] sm:$0xff] %v784_v38  ;;  %v787_v41 = vadd.f32 %v1413_v39, %v586_v37  ;;  %823 = sbr.rel (%p1271_p7) target bundleno = 844 (0x34c), region = 56 }
 0x245   : > { %v744_v42 = vpop.f32.mrf.mxu1 }
 0x246   : > { %819 = vst [vmem:[#allocation2 + $0x98] sm:$0xff] %v787_v41  ;;  %v785_v43 = vadd.f32 %v744_v42, %v584_v40 }
 0x248   : > { %817 = vst [vmem:[#allocation2 + $0xf8] sm:$0xff] %v785_v43 }
 0x249   : > { %v1612_v44 = vld [vmem:[%s2149_s4 + $0x38] sm:$0xff]   ;;  %v1613_v45 = vld [vmem:[%s2149_s4 + $0x30] sm:$0xff]   ;;  %v1614_v46 = vld [vmem:[%s2149_s4 + $0x28] sm:$0xff]  }
 0x24a   : > { %1414 = vmatprep.subr.bf16.mxu0 %v1612_v44  ;;  %1478 = vmatprep.subr.bf16.mxu1 %v1612_v44  ;;  %v1615_v47 = vld [vmem:[%s2149_s4 + $0x20] sm:$0xff]   ;;  %v824_v48 = vld [vmem:[#allocation2 + $0xb0] sm:$0xff]  ;;  %v840_v50 = vld [vmem:[#allocation2 + $0x38] sm:$0xff] }
 0x24b   : > { %1415 = vmatpush3.bf16.msra.mxu0 %v1612_v44  ;;  %1486 = vmatpush3.bf16.msra.mxu1 %v1612_v44  ;;  %v825_v49 = vld [vmem:[#allocation2] sm:$0xff]  ;;  %v841_v52 = vld [vmem:[#allocation2 + $0x58] sm:$0xff]  ;;  %v1617_v55 = vld [vmem:[%s2149_s4 + $0x10] sm:$0xff]  }
 0x24c   : > { %1416 = vmatprep.subr.bf16.mxu0 %v1613_v45  ;;  %1479 = vmatprep.subr.bf16.mxu1 %v1613_v45  ;;  %v856_v51 = vpack.c.bf16 %v825_v49, %v824_v48  ;;  %v864_v53 = vpack.c.bf16 %v841_v52, %v840_v50  ;;  %v1616_v54 = vld [vmem:[%s2149_s4 + $0x18] sm:$0xff]   ;;  %v1618_v56 = vld [vmem:[%s2149_s4 + $0x8] sm:$0xff]   ;;  %v1619_v57 = vld [vmem:[%s2149_s4] sm:$0xff]  }
 0x24d   : > { %v826_v58 = vld [vmem:[#allocation2 + $0xd8] sm:$0xff]  ;;  %v842_v60 = vld [vmem:[#allocation2 + $0x40] sm:$0xff]  ;;  %v843_v61 = vld [vmem:[#allocation2 + $0xc8] sm:$0xff] }
 0x24e   : > { %1430 = vmatprep.mubr.bf16.mxu0 %v856_v51  ;;  %1446 = vmatprep.mubr.bf16.mxu1 %v864_v53  ;;  %v827_v59 = vld [vmem:[#allocation2 + $0x18] sm:$0xff]  ;;  %v828_v62 = vld [vmem:[#allocation2 + $0x50] sm:$0xff]  ;;  %v829_v63 = vld [vmem:[#allocation2 + $0x68] sm:$0xff]  ;;  %v865_v3 = vpack.c.bf16 %v843_v61, %v842_v60 }
 0x24f   : > { %1417 = vmatpush3.bf16.msra.mxu0 %v1613_v45  ;;  %1487 = vmatpush3.bf16.msra.mxu1 %v1613_v45  ;;  %v844_v0 = vld [vmem:[#allocation2 + $0xe0] sm:$0xff]  ;;  %v845_v1 = vld [vmem:[#allocation2 + $0x90] sm:$0xff]  ;;  %v857_v2 = vpack.c.bf16 %v827_v59, %v826_v58  ;;  %v858_v4 = vpack.c.bf16 %v829_v63, %v828_v62  ;;  %v831_v7 = vld [vmem:[#allocation2 + $0x48] sm:$0xff] }
 0x250   : > { %1418 = vmatprep.subr.bf16.mxu0 %v1614_v46  ;;  %1480 = vmatprep.subr.bf16.mxu1 %v1614_v46  ;;  %v866_v5 = vpack.c.bf16 %v845_v1, %v844_v0  ;;  %v830_v6 = vld [vmem:[#allocation2 + $0x30] sm:$0xff]  ;;  %v847_v9 = vld [vmem:[#allocation2 + $0xc0] sm:$0xff]  ;;  %v833_v11 = vld [vmem:[#allocation2 + $0x88] sm:$0xff] }
 0x251   : > { %v846_v8 = vld [vmem:[#allocation2 + $0x70] sm:$0xff]  ;;  %v832_v10 = vld [vmem:[#allocation2 + $0x80] sm:$0xff]  ;;  %v848_v12 = vld [vmem:[#allocation2 + $0xa8] sm:$0xff]  ;;  %v859_v14 = vpack.c.bf16 %v831_v7, %v830_v6 }
 0x252   : > { %v849_v13 = vld [vmem:[#allocation2 + $0xd0] sm:$0xff]  ;;  %v867_v15 = vpack.c.bf16 %v847_v9, %v846_v8  ;;  %v860_v16 = vpack.c.bf16 %v833_v11, %v832_v10  ;;  %v834_v18 = vld [vmem:[#allocation2 + $0xe8] sm:$0xff]  ;;  %v835_v19 = vld [vmem:[#allocation2 + $0xb8] sm:$0xff] }
 0x253   : > { %1419 = vmatpush3.bf16.msra.mxu0 %v1614_v46  ;;  %1488 = vmatpush3.bf16.msra.mxu1 %v1614_v46  ;;  %v868_v17 = vpack.c.bf16 %v849_v13, %v848_v12  ;;  %v850_v20 = vld [vmem:[#allocation2 + $0x10] sm:$0xff]  ;;  %v851_v21 = vld [vmem:[#allocation2 + $0x28] sm:$0xff]  ;;  %v836_v22 = vld [vmem:[#allocation2 + $0x60] sm:$0xff]  ;;  %v861_v26 = vpack.c.bf16 %v835_v19, %v834_v18 }
 0x254   : > { %1420 = vmatprep.subr.bf16.mxu0 %v1615_v47  ;;  %1481 = vmatprep.subr.bf16.mxu1 %v1615_v47  ;;  %v837_v23 = vld [vmem:[#allocation2 + $0xf0] sm:$0xff]  ;;  %v852_v24 = vld [vmem:[#allocation2 + $0xa0] sm:$0xff]  ;;  %v853_v25 = vld [vmem:[#allocation2 + $0xf8] sm:$0xff]  ;;  %v869_v27 = vpack.c.bf16 %v851_v21, %v850_v20 }
 0x255   : > { %v862_v28 = vpack.c.bf16 %v837_v23, %v836_v22  ;;  %v870_v29 = vpack.c.bf16 %v853_v25, %v852_v24  ;;  %v838_v30 = vld [vmem:[#allocation2 + $0x8] sm:$0xff]  ;;  %v839_v31 = vld [vmem:[#allocation2 + $0x78] sm:$0xff]  ;;  %v854_v32 = vld [vmem:[#allocation2 + $0x20] sm:$0xff] }
 0x256   : > { %v855_v33 = vld [vmem:[#allocation2 + $0x98] sm:$0xff]  ;;  %v863_v34 = vpack.c.bf16 %v839_v31, %v838_v30  ;;  %v2008_v36 = vld [vmem:[%s2150_s5] ss:$0 sm:$0xff] }
 0x257   : > { %1421 = vmatpush3.bf16.msra.mxu0 %v1615_v47  ;;  %1489 = vmatpush3.bf16.msra.mxu1 %v1615_v47  ;;  %v871_v35 = vpack.c.bf16 %v855_v33, %v854_v32 }
 0x258   : > { %1422 = vmatprep.subr.bf16.mxu0 %v1616_v54  ;;  %1482 = vmatprep.subr.bf16.mxu1 %v1616_v54 }
 0x25b   : > { %1423 = vmatpush3.bf16.msra.mxu0 %v1616_v54  ;;  %1490 = vmatpush3.bf16.msra.mxu1 %v1616_v54 }
 0x25c   : > { %1424 = vmatprep.subr.bf16.mxu0 %v1617_v55  ;;  %1483 = vmatprep.subr.bf16.mxu1 %v1617_v55 }
 0x25f   : > { %1425 = vmatpush3.bf16.msra.mxu0 %v1617_v55  ;;  %1491 = vmatpush3.bf16.msra.mxu1 %v1617_v55 }
 0x260   : > { %1426 = vmatprep.subr.bf16.mxu0 %v1618_v56  ;;  %1484 = vmatprep.subr.bf16.mxu1 %v1618_v56 }
 0x263   : > { %1427 = vmatpush3.bf16.msra.mxu0 %v1618_v56  ;;  %1492 = vmatpush3.bf16.msra.mxu1 %v1618_v56 }
 0x264   : > { %1428 = vmatprep.subr.bf16.mxu0 %v1619_v57  ;;  %1485 = vmatprep.subr.bf16.mxu1 %v1619_v57 }
 0x267   : > { %1429 = vmatpush3.bf16.msra.mxu0 %v1619_v57  ;;  %1493 = vmatpush3.bf16.msra.mxu1 %v1619_v57 }
 0x26a   : > { %1431 = vmatmul.mubr.bf16.vlgmr.msra.gmra.mxu0 %v857_v2  ;;  %1447 = vmatmul.mubr.bf16.vlgmr.msra.gmra.mxu1 %v865_v3 }
 0x26b   : > { %1434 = vmatprep.mubr.bf16.mxu0 %v858_v4  ;;  %1450 = vmatprep.mubr.bf16.mxu1 %v866_v5 }
 0x272   : > { %1435 = vmatmul.mubr.bf16.gmra.mxu0 %v859_v14  ;;  %1451 = vmatmul.mubr.bf16.gmra.mxu1 %v867_v15 }
 0x273   : > { %1438 = vmatprep.mubr.bf16.mxu0 %v860_v16  ;;  %1454 = vmatprep.mubr.bf16.mxu1 %v868_v17 }
 0x27a   : > { %1439 = vmatmul.mubr.bf16.gmra.mxu0 %v861_v26  ;;  %1455 = vmatmul.mubr.bf16.gmra.mxu1 %v869_v27 }
 0x27b   : > { %1442 = vmatprep.mubr.bf16.mxu0 %v862_v28  ;;  %1458 = vmatprep.mubr.bf16.mxu1 %v870_v29 }
 0x282   : > { %1443 = vmatmul.mubr.bf16.gmra.mxu0 %v863_v34  ;;  %1459 = vmatmul.mubr.bf16.gmra.mxu1 %v871_v35 }
 0x32a   : > { %v1432_v37 = vpop.f32.mrf.mxu0  ;;  %v1448_v38 = vpop.f32.mrf.mxu1 }
 0x32b   : > { %v986_v39 = vadd.f32 %v1432_v37, %v2008_v36  ;;  %v1050_v40 = vadd.f32 %v1448_v38, %v2008_v36 }
 0x32c   : > { %v977_v41 = vpop.f32.mrf.mxu0  ;;  %v1041_v42 = vpop.f32.mrf.mxu1 }
 0x32d   : > { %1106 = vst [vmem:[%s1940_s24 + $0x10] sm:$0xff] %v986_v39  ;;  %1122 = vst [vmem:[%s1940_s24 + $0x90] sm:$0xff] %v1050_v40  ;;  %v978_v43 = vadd.f32 %v2008_v36, %v977_v41  ;;  %v1042_v44 = vadd.f32 %v2008_v36, %v1041_v42 }
 0x32e   : > { %v1433_v45 = vpop.f32.mrf.mxu0  ;;  %v1449_v46 = vpop.f32.mrf.mxu1 }
 0x32f   : > { %1104 = vst [vmem:[%s1940_s24] sm:$0xff] %v978_v43  ;;  %1120 = vst [vmem:[%s1940_s24 + $0x80] sm:$0xff] %v1042_v44  ;;  %v989_v47 = vadd.f32 %v1433_v45, %v2008_v36  ;;  %v1053_v48 = vadd.f32 %v1449_v46, %v2008_v36 }
 0x330   : > { %v980_v49 = vpop.f32.mrf.mxu0  ;;  %v1044_v50 = vpop.f32.mrf.mxu1 }
 0x331   : > { %1107 = vst [vmem:[%s1940_s24 + $0x18] sm:$0xff] %v989_v47  ;;  %1123 = vst [vmem:[%s1940_s24 + $0x98] sm:$0xff] %v1053_v48  ;;  %v981_v51 = vadd.f32 %v2008_v36, %v980_v49  ;;  %v1045_v52 = vadd.f32 %v2008_v36, %v1044_v50 }
 0x332   : > { %v1436_v53 = vpop.f32.mrf.mxu0  ;;  %v1452_v54 = vpop.f32.mrf.mxu1 }
 0x333   : > { %1105 = vst [vmem:[%s1940_s24 + $0x8] sm:$0xff] %v981_v51  ;;  %1121 = vst [vmem:[%s1940_s24 + $0x88] sm:$0xff] %v1045_v52  ;;  %v1002_v55 = vadd.f32 %v1436_v53, %v2008_v36  ;;  %v1066_v56 = vadd.f32 %v1452_v54, %v2008_v36 }
 0x334   : > { %v993_v57 = vpop.f32.mrf.mxu0  ;;  %v1057_v58 = vpop.f32.mrf.mxu1 }
 0x335   : > { %1110 = vst [vmem:[%s1940_s24 + $0x30] sm:$0xff] %v1002_v55  ;;  %1126 = vst [vmem:[%s1940_s24 + $0xb0] sm:$0xff] %v1066_v56  ;;  %v994_v59 = vadd.f32 %v2008_v36, %v993_v57  ;;  %v1058_v60 = vadd.f32 %v2008_v36, %v1057_v58 }
 0x336   : > { %v1437_v61 = vpop.f32.mrf.mxu0  ;;  %v1453_v62 = vpop.f32.mrf.mxu1 }
 0x337   : > { %1108 = vst [vmem:[%s1940_s24 + $0x20] sm:$0xff] %v994_v59  ;;  %1124 = vst [vmem:[%s1940_s24 + $0xa0] sm:$0xff] %v1058_v60  ;;  %v1005_v63 = vadd.f32 %v1437_v61, %v2008_v36  ;;  %v1069_v0 = vadd.f32 %v1453_v62, %v2008_v36 }
 0x338   : > { %v996_v1 = vpop.f32.mrf.mxu0  ;;  %v1060_v2 = vpop.f32.mrf.mxu1 }
 0x339   : > { %1111 = vst [vmem:[%s1940_s24 + $0x38] sm:$0xff] %v1005_v63  ;;  %1127 = vst [vmem:[%s1940_s24 + $0xb8] sm:$0xff] %v1069_v0  ;;  %v997_v3 = vadd.f32 %v2008_v36, %v996_v1  ;;  %v1061_v4 = vadd.f32 %v2008_v36, %v1060_v2 }
 0x33a   : > { %v1440_v5 = vpop.f32.mrf.mxu0  ;;  %v1456_v6 = vpop.f32.mrf.mxu1 }
 0x33b   : > { %1109 = vst [vmem:[%s1940_s24 + $0x28] sm:$0xff] %v997_v3  ;;  %1125 = vst [vmem:[%s1940_s24 + $0xa8] sm:$0xff] %v1061_v4  ;;  %v1018_v7 = vadd.f32 %v1440_v5, %v2008_v36  ;;  %v1082_v8 = vadd.f32 %v1456_v6, %v2008_v36 }
 0x33c   : > { %v1009_v9 = vpop.f32.mrf.mxu0  ;;  %v1073_v10 = vpop.f32.mrf.mxu1 }
 0x33d   : > { %1114 = vst [vmem:[%s1940_s24 + $0x50] sm:$0xff] %v1018_v7  ;;  %1130 = vst [vmem:[%s1940_s24 + $0xd0] sm:$0xff] %v1082_v8  ;;  %v1010_v11 = vadd.f32 %v2008_v36, %v1009_v9  ;;  %v1074_v12 = vadd.f32 %v2008_v36, %v1073_v10 }
 0x33e   : > { %v1441_v13 = vpop.f32.mrf.mxu0  ;;  %v1457_v14 = vpop.f32.mrf.mxu1 }
 0x33f   : > { %1112 = vst [vmem:[%s1940_s24 + $0x40] sm:$0xff] %v1010_v11  ;;  %1128 = vst [vmem:[%s1940_s24 + $0xc0] sm:$0xff] %v1074_v12  ;;  %v1021_v15 = vadd.f32 %v1441_v13, %v2008_v36  ;;  %v1085_v16 = vadd.f32 %v1457_v14, %v2008_v36 }
 0x340   : > { %v1012_v17 = vpop.f32.mrf.mxu0  ;;  %v1076_v18 = vpop.f32.mrf.mxu1 }
 0x341   : > { %1115 = vst [vmem:[%s1940_s24 + $0x58] sm:$0xff] %v1021_v15  ;;  %1131 = vst [vmem:[%s1940_s24 + $0xd8] sm:$0xff] %v1085_v16  ;;  %v1013_v19 = vadd.f32 %v2008_v36, %v1012_v17  ;;  %v1077_v20 = vadd.f32 %v2008_v36, %v1076_v18 }
 0x342   : > { %v1444_v21 = vpop.f32.mrf.mxu0  ;;  %v1460_v22 = vpop.f32.mrf.mxu1 }
 0x343   : > { %1113 = vst [vmem:[%s1940_s24 + $0x48] sm:$0xff] %v1013_v19  ;;  %1129 = vst [vmem:[%s1940_s24 + $0xc8] sm:$0xff] %v1077_v20  ;;  %v1034_v23 = vadd.f32 %v1444_v21, %v2008_v36  ;;  %v1098_v24 = vadd.f32 %v1460_v22, %v2008_v36 }
 0x344   : > { %v1025_v25 = vpop.f32.mrf.mxu0  ;;  %v1089_v26 = vpop.f32.mrf.mxu1 }
 0x345   : > { %1118 = vst [vmem:[%s1940_s24 + $0x70] sm:$0xff] %v1034_v23  ;;  %1134 = vst [vmem:[%s1940_s24 + $0xf0] sm:$0xff] %v1098_v24  ;;  %v1026_v27 = vadd.f32 %v2008_v36, %v1025_v25  ;;  %v1090_v28 = vadd.f32 %v2008_v36, %v1089_v26 }
 0x346   : > { %v1445_v29 = vpop.f32.mrf.mxu0  ;;  %v1461_v30 = vpop.f32.mrf.mxu1 }
 0x347   : > { %1116 = vst [vmem:[%s1940_s24 + $0x60] sm:$0xff] %v1026_v27  ;;  %1132 = vst [vmem:[%s1940_s24 + $0xe0] sm:$0xff] %v1090_v28  ;;  %v1037_v31 = vadd.f32 %v1445_v29, %v2008_v36  ;;  %v1101_v32 = vadd.f32 %v1461_v30, %v2008_v36 }
 0x348   : > { %v1028_v33 = vpop.f32.mrf.mxu0  ;;  %v1092_v34 = vpop.f32.mrf.mxu1 }
 0x349   : > { %1119 = vst [vmem:[%s1940_s24 + $0x78] sm:$0xff] %v1037_v31  ;;  %1135 = vst [vmem:[%s1940_s24 + $0xf8] sm:$0xff] %v1101_v32  ;;  %v1029_v35 = vadd.f32 %v2008_v36, %v1028_v33  ;;  %v1093_v37 = vadd.f32 %v2008_v36, %v1092_v34 }
 0x34b   : > { %1117 = vst [vmem:[%s1940_s24 + $0x68] sm:$0xff] %v1029_v35  ;;  %1133 = vst [vmem:[%s1940_s24 + $0xe8] sm:$0xff] %v1093_v37 }
 0x34c PF: > { %s2170_s13 = sld [smem:[#allocation10_spill]]  ;;  %s1150_s18 = sshll.u32 %s1940_s24, 4  ;;  %s2081_s18 = int_to_ptr.vmem [resolvable:$true] %s1150_s18 }
 0x34d   : > { %s2172_s19 = sld [smem:[#allocation15_spill]]  ;;  %s2085_s26 = scalar_lea.sflag [#allocation5], %s283_s9 }
 0x34e   : > { %s1648_s6 = scalar_lea.vmem %s2081_s18, 4096  ;;  %s1775_s15 = smov [#allocation6]  }
 0x34f   : > { %p1649_p6 = scmp.ne.s32.totalorder %s2081_s18, %s1648_s6  ;;  %s1652_s16 = sshll.u32 %s1775_s15, 4  ;;  %s1653_s16 = int_to_ptr.vmem [resolvable:$false] %s1652_s16 }
 0x350   : > { %s1654_s12 = scalar_lea.vmem %s1653_s16, 8192  ;;  %p1655_p10 = scmp.lt.s32.totalorder %s2081_s18, %s1653_s16 }
 0x351   : > { %p1650_p8 = pnand %p1649_p6, %p1895_p12  ;;  %p1656_p11 = scmp.lt.s32.totalorder %s1654_s12, %s1648_s6 }
 0x352   : > { %s1287_s27 = sshll.u32 %s2170_s13, 12 }
 0x353   : > { %s2078_s8 = scalar_lea.hbm %s2172_s19, %s1287_s27  ;;  %p1651_p9 = pneg %p1650_p8 }
 0x354   : > { %p1657_p13 = por %p1656_p11, %p1655_p10 }
 0x356   : > { %p1658_p0 = pnand %p1657_p13, %p1651_p9 }
 0x358   : > { %1661 = shalt.err (!%p1658_p0)
}
 0x359   : > { %s1662_s9 = scalar_lea.hbm %s2078_s8, 4096  ;;  %s1666_s13 = scalar_lea.hbm %s2172_s19, 8192 }
 0x35a   : > { %p1663_p3 = scmp.ne.s32.totalorder %s2078_s8, %s1662_s9  ;;  %p1667_p4 = scmp.lt.s32.totalorder %s2078_s8, %s2172_s19 }
 0x35b   : > { %p1668_p7 = scmp.lt.s32.totalorder %s1666_s13, %s1662_s9 }
 0x35c   : > { %p1664_p1 = pnand %p1663_p3, %p1895_p12 }
 0x35d   : > { %p1669_p6 = por %p1668_p7, %p1667_p4 }
 0x35e   : > { %p1665_p5 = pneg %p1664_p1 }
 0x360   : > { %p1670_p8 = pnand %p1669_p6, %p1665_p5 }
 0x362   : > { %1673 = shalt.err (!%p1670_p8)
}
 0x363   : > { %s1776_s14 = smov 128   ;;  %s1777_s6 = smov 8  }
 0x364   : > { %1496 = dma.vmem_to_hbm [thread:$0]  (%p1895_p12), %s2081_s18, 4096, %s2078_s8, %s2085_s26, %s1776_s14, %s1776_s14, %s1777_s6  }
 0x365 PF: > { %p1507_p9 = scmp.ge.s32.totalorder %s1768_s7, 2  ;;  %s1165_s15 = sand.u32 1, %s1728_s21  }
 0x366   : > { %s1166_s16 = scalar_lea.sflag [#allocation5], %s1165_s15 }
 0x367   : > { %p1503_p10 = pnand %p1507_p9, %p1908_p2 }
 0x369   : > { %p1504_p11 = pneg %p1503_p10 }
 0x36b   : > { %1723 = dma.done.wait (%p1504_p11), %s1166_s16, 4096  }
 0x36c   : > { %1725 = vsyncadd (%p1504_p11), %s1166_s16, 4294963200  ;;  %s22_s7 = sadd.s32 1, %s1768_s7   ;;  %s2173_s17 = sld [smem:[#allocation9_spill]] }
 0x36d   : > { %p19_p13 = scmp.ge.s32.totalorder %s22_s7, 10   ;;  %s2174_s26 = sld [smem:[#allocation14_spill]] }
 0x36e   : > { %s2175_s8 = sld [smem:[#allocation11_spill]]  ;;  %s2177_s21 = smov %s1732_s22 }
 0x36f   : > { %s2176_s18 = sld [smem:[#allocation12_spill]]  ;;  %s2178_s22 = smov %s1736_s23 }
 0x370   : > { %s2179_s23 = smov %s1900_s20  ;;  %s2180_s24 = smov %s1744_s25 }
 0x371   : > { %s2182_s27 = smov %s1760_s29  ;;  %s2183_s28 = smov %s1764_s30 }
 0x372   : > { %s2181_s25 = smov %s2173_s17  ;;  %21 = sbr.rel (!%p19_p13) target bundleno = 11 (0xb), region = 98 }
 0x374   : > { %s2184_s29 = smov %s2175_s8 }
 0x375   : > { %s2185_s30 = smov %s2176_s18 }
 0x377   :  { %1171 = vsyncpa [#allocation4], 1 }
 0x378   :  { %1173 = vsyncpa [#allocation4 + $0x1], 1 }
 0x379   :  { %1174 = vsyncpa [#allocation5], 1 }
 0x37a   :  { %1176 = vsyncpa [#allocation5 + $0x1], 1 }

</bundles_post_ra>
